<compile_context>
chip_gen: v7x
topology: tpu7x:2x2x1
jax: 0.10.0
libtpu: 0.0.40
codegen_flags: <defaults>
</compile_context>

<pallas_src>
import jax
import jax.numpy as jnp
from jax.experimental import pallas as pl
from jax.experimental.pallas import tpu as pltpu


def _copy_kernel(x_ref, o_ref):
    # Elementwise identity copy of the tile (forward values of Partial_Detach).
    o_ref[...] = x_ref[...]


# Sublane multiple per itemsize (f32 -> 8, bf16/f16 -> 16, int8/fp8 -> 32).
_SUBLANE = {4: 8, 2: 16, 1: 32}
_MIN_SPLIT_BYTES = 2 * 1024 * 1024  # force >=2 grid steps above this (v7x 2 TCs)


def _vmem_capacity_bytes():
    """Physical VMEM per TensorCore; conservative 64 MiB (v7x) if unknown."""
    try:
        cap = int(getattr(pltpu.get_tpu_info(), "vmem_capacity_bytes"))
        if cap > 0:
            return cap
    except Exception:
        pass
    return 64 * 1024 * 1024


def _tile_budget_bytes(vmem_cap):
    # v5e/v6e (128 MiB VMEM): ~8 MiB tiles; v7x (64 MiB): ~4 MiB tiles.
    return 8 * 1024 * 1024 if vmem_cap >= 100 * 1024 * 1024 else 4 * 1024 * 1024


def _vmem_limit(vmem_cap, tile_bytes):
    # Double-buffered input + output (4 x tile) + headroom, capped at 3/4 of
    # physical VMEM; also comfortably above v5e's 16 MiB scoped default.
    want = max(32 * 1024 * 1024, 4 * tile_bytes + 8 * 1024 * 1024)
    return int(min(3 * vmem_cap // 4, want))


def _pallas_copy_2d(x2d, donate_input):
    """Lane-dense 2D identity copy (last dim is a large multiple of 128)."""
    rows, cols = x2d.shape
    itemsize = jnp.dtype(x2d.dtype).itemsize
    sublane = _SUBLANE.get(itemsize, 8)
    nbytes = rows * cols * itemsize

    vmem_cap = _vmem_capacity_bytes()
    tile_budget = _tile_budget_bytes(vmem_cap)

    # Row tile: ~tile_budget bytes, rounded down to a sublane multiple.
    row_tile = max(1, tile_budget // (cols * itemsize))
    row_tile = max(sublane, (row_tile // sublane) * sublane)
    row_tile = min(row_tile, rows)

    # v7x: make sure medium/large tensors get >= 2 steps on the "parallel"
    # axis so both TensorCores (and HBM paths) are used.
    if (nbytes >= _MIN_SPLIT_BYTES and rows > sublane
            and pl.cdiv(rows, row_tile) == 1):
        half = -(-(rows // 2) // sublane) * sublane  # ceil(rows/2) to sublane
        row_tile = max(sublane, min(row_tile, half))

    grid = (pl.cdiv(rows, row_tile),)
    tile_bytes = row_tile * cols * itemsize

    return pl.pallas_call(
        _copy_kernel,
        out_shape=jax.ShapeDtypeStruct((rows, cols), x2d.dtype),
        grid_spec=pltpu.PrefetchScalarGridSpec(
            num_scalar_prefetch=0,
            grid=grid,
            in_specs=[pl.BlockSpec((row_tile, cols), lambda i: (i, 0))],
            out_specs=pl.BlockSpec((row_tile, cols), lambda i: (i, 0)),
        ),
        compiler_params=pltpu.CompilerParams(
            dimension_semantics=("parallel",),
            vmem_limit_bytes=_vmem_limit(vmem_cap, tile_bytes),
        ),
        cost_estimate=pl.CostEstimate(
            flops=0, transcendentals=0, bytes_accessed=2 * nbytes),
        input_output_aliases=({0: 0} if donate_input else {}),
    )(x2d)


def _pallas_copy_1d(x1d, donate_input):
    """Fallback for total sizes that are not a multiple of 128: flat 1-D tiling
    with a 1024-element-multiple block and a masked ragged tail (bounded VMEM
    for any input size)."""
    (n,) = x1d.shape
    itemsize = jnp.dtype(x1d.dtype).itemsize
    nbytes = n * itemsize

    vmem_cap = _vmem_capacity_bytes()
    tile_budget = _tile_budget_bytes(vmem_cap)

    tile_elems = max(1024, (tile_budget // itemsize) // 1024 * 1024)
    if tile_elems >= n:
        tile_elems = n  # single full-array block (always a legal block shape)
    grid = (pl.cdiv(n, tile_elems),)
    tile_bytes = tile_elems * itemsize

    return pl.pallas_call(
        _copy_kernel,
        out_shape=jax.ShapeDtypeStruct((n,), x1d.dtype),
        grid_spec=pltpu.PrefetchScalarGridSpec(
            num_scalar_prefetch=0,
            grid=grid,
            in_specs=[pl.BlockSpec((tile_elems,), lambda i: (i,))],
            out_specs=pl.BlockSpec((tile_elems,), lambda i: (i,)),
        ),
        compiler_params=pltpu.CompilerParams(
            dimension_semantics=("parallel",),
            vmem_limit_bytes=_vmem_limit(vmem_cap, tile_bytes),
        ),
        cost_estimate=pl.CostEstimate(
            flops=0, transcendentals=0, bytes_accessed=2 * nbytes),
        input_output_aliases=({0: 0} if donate_input else {}),
    )(x1d)


def _forward_values(x, donate_input=False):
    """Identity copy of x through the Pallas kernel, using a lane-dense slab."""
    orig_shape = x.shape
    n = x.size
    if n == 0:
        return x

    # Largest 128-multiple that divides the total size -> full vregs, unmasked
    # stores (lane-dense output is the biggest single lever for a copy kernel).
    lanes = None
    for cand in (2048, 1024, 512, 256, 128):
        if n % cand == 0:
            lanes = cand
            break

    if lanes is not None:
        out = _pallas_copy_2d(x.reshape(n // lanes, lanes), donate_input)
    else:
        out = _pallas_copy_1d(x.reshape(n), donate_input)
    return out.reshape(orig_shape)


def make_partial_detach(alpha=0, *, use_pallas_copy=True, donate_input=False):
    """Returns a function with Partial_Detach(alpha) semantics.

    NOTE: the PyTorch module hard-codes self.alpha = 0 in __init__, so the
    reference behaviour is a full detach; the general form is kept anyway.
    Fastest production path: use_pallas_copy=False — the forward returns `x`
    untouched (zero HBM traffic) and the custom_vjp alone scales the gradient.
    """

    def _values(x):
        if use_pallas_copy:
            return _forward_values(x, donate_input=donate_input)
        return x  # elided copy; semantics live entirely in the VJP

    @jax.custom_vjp
    def partial_detach(x):
        return _values(x)

    def fwd(x):
        return _values(x), None

    def bwd(_, g):
        # d/dx [alpha*x + (1-alpha)*stop_gradient(x)] = alpha
        if alpha == 0:
            return (jnp.zeros_like(g),)   # no g*0 read+write pass
        if alpha == 1:
            return (g,)                   # no extra mem-bound multiply
        return (g * alpha,)

    partial_detach.defvjp(fwd, bwd)
    return partial_detach


if __name__ == "__main__":
    key = jax.random.PRNGKey(0)

    # Small NCHW feature map (batch=2, channels=4, spatial=16x16).
    x = jax.random.normal(key, (2, 4, 16, 16), dtype=jnp.float32)

    partial_detach = make_partial_detach(alpha=0)  # module forces alpha = 0

    # Forward values must match the input exactly.
    y = jax.jit(partial_detach)(x)
    jax.block_until_ready(y)
    assert y.shape == x.shape and y.dtype == x.dtype
    assert bool(jnp.all(y == x))

    # alpha == 0 -> gradient fully stopped (detach).
    g0 = jax.grad(lambda t: jnp.sum(partial_detach(t) ** 2))(x)
    jax.block_until_ready(g0)
    assert bool(jnp.all(g0 == 0.0))

    # alpha == 1 -> identity gradient (general form of the module).
    pd1 = make_partial_detach(alpha=1)
    g1 = jax.grad(lambda t: jnp.sum(pd1(t) ** 2))(x)
    jax.block_until_ready(g1)
    assert bool(jnp.allclose(g1, 2.0 * x))

    # Total size not a multiple of 128 -> exercises the hardened flat-1D path.
    x_odd = jax.random.normal(jax.random.PRNGKey(0), (2, 4, 15, 15),
                              dtype=jnp.float32)
    y_odd = jax.jit(partial_detach)(x_odd)
    jax.block_until_ready(y_odd)
    assert bool(jnp.all(y_odd == x_odd))

    print("KERNEL_OK")
</pallas_src>

<mosaic_0001>
module attributes {stable_mosaic.version = 11 : i64} {
  func.func @_copy_kernel(%arg0: i32, %arg1: memref<1x2048xf32, #tpu.memory_space<vmem>>, %arg2: memref<1x2048xf32, #tpu.memory_space<vmem>>) attributes {dimension_semantics = [#tpu.dimension_semantics<parallel>], iteration_bounds = array<i64: 1>, scalar_prefetch = 0 : i64, scratch_operands = 0 : i64, tpu.core_type = #tpu.core_type<tc>, window_params = [{transform_indices = @transform_0, window_bounds = array<i64: 1, 2048>}, {transform_indices = @transform_1, window_bounds = array<i64: 1, 2048>}]} {
    %c0 = arith.constant 0 : index
    %c0_0 = arith.constant 0 : index
    %0 = vector.load %arg1[%c0, %c0_0] : memref<1x2048xf32, #tpu.memory_space<vmem>>, vector<1x2048xf32>
    %c0_1 = arith.constant 0 : index
    %c0_2 = arith.constant 0 : index
    %1 = vector.load %arg2[%c0_1, %c0_2] : memref<1x2048xf32, #tpu.memory_space<vmem>>, vector<1x2048xf32>
    tpu.vector_store %arg2[%c0_1, %c0_2], %0 {strides = array<i32>} : memref<1x2048xf32, #tpu.memory_space<vmem>>, vector<1x2048xf32>,
    return
  }
  func.func @transform_0(%arg0: i32) -> (i32, i32) {
    %c0_i32 = arith.constant 0 : i32
    %c0_i32_0 = arith.constant 0 : i32
    return %arg0, %c0_i32 : i32, i32
  }
  func.func @transform_1(%arg0: i32) -> (i32, i32) {
    %c0_i32 = arith.constant 0 : i32
    %c0_i32_0 = arith.constant 0 : i32
    return %arg0, %c0_i32 : i32, i32
  }
}

</mosaic_0001>

<bundles_post_ra>
// kernel: partial_detach.1
= control target key start
LH: loop header
LB: loop body
LE: loop exit
PB: predicated region body
PF: predicated region fallthrough
CT: control target
= control target key end

     0   :  { %s38_s0 = inlined_call_operand.vmem [shape: f32[1,2048], index: 0, kind: input, shape index: {}]   ;;  %s39_s1 = inlined_call_operand.vmem [shape: f32[1,2048], index: 1, kind: output, shape index: {}]  }
   0x1   :  { %v8_v0 = vld [vmem:[%s38_s0] sm:$0xff]  ;;  %v9_v1 = vld [vmem:[%s38_s0 + $0x8] sm:$0xff] }
   0x2   :  { %10 = vst [vmem:[%s39_s1] sm:$0xff] %v8_v0  ;;  %11 = vst [vmem:[%s39_s1 + $0x8] sm:$0xff] %v9_v1 }

</bundles_post_ra>
